<compile_context>
chip_gen: v5e
topology: v5e:2x2
jax: 0.10.0
libtpu: 0.0.40
codegen_flags: <defaults>
</compile_context>

<pallas_src>
import jax
import jax.numpy as jnp
from jax.experimental import pallas as pl
from jax.experimental.pallas import tpu as pltpu


def mlp_kernel(x_ref, w1t_ref, b1_ref, w2t_ref, b2_ref, o_ref):
    # First linear: x (TB, in) @ w1t (in, hid) -> MXU, f32 accumulator.
    h = jnp.dot(x_ref[...], w1t_ref[...], preferred_element_type=jnp.float32)
    # Bias + ReLU fused on the VPU, still in f32.
    h = jnp.maximum(h + b1_ref[...], 0.0)
    # Second linear: h (TB, hid) @ w2t (hid, out).
    y = jnp.dot(h, w2t_ref[...], preferred_element_type=jnp.float32)
    o_ref[...] = (y + b2_ref[...]).astype(o_ref.dtype)


def my_mlp_forward(x, w1, b1, w2, b2, *, tile_b=4096):
    """Forward pass of MyMLP (lc1 -> ReLU -> lc2).

    Args:
      x:  (B, in_dim)    float32   (pre-flattened images, as the module expects)
      w1: (hid, in_dim)  float32   (PyTorch nn.Linear weight convention)
      b1: (hid,)         float32
      w2: (out, hid)     float32
      b2: (out,)         float32
      tile_b: batch tile (multiple of 8). Default 4096 fits the v5e 16 MiB
        scoped VMEM default with double buffering; raise vmem_limit_bytes via
        CompilerParams before going much higher.
    Returns:
      (B, out) float32
    """
    B, in_dim = x.shape
    hid_dim = w1.shape[0]
    out_dim = w2.shape[0]
    assert tile_b % 8 == 0, "tile_b must be a multiple of 8 (sublane tiling)"

    # One-time wrapper-side re-layout of the tiny weights so the kernel uses
    # canonical contractions on the VMEM-resident copies (no per-step XLU
    # re-orientation).  Biases as (1, dim) rows broadcast over batch.
    w1t = w1.T                      # (in_dim, hid_dim)
    w2t = w2.T                      # (hid_dim, out_dim)
    b1_2d = b1.reshape(1, hid_dim)
    b2_2d = b2.reshape(1, out_dim)

    itemsize = jnp.dtype(x.dtype).itemsize
    cost = pl.CostEstimate(
        flops=2 * B * (in_dim * hid_dim + hid_dim * out_dim),
        transcendentals=0,
        bytes_accessed=itemsize * (x.size + w1.size + b1.size + w2.size
                                   + b2.size + B * out_dim),
    )
    out_shape = jax.ShapeDtypeStruct((B, out_dim), x.dtype)

    if B <= tile_b:
        # Small batch: a single block anyway — gridless invocation, whole
        # arrays as VMEM blocks, no per-step pipeline overhead.
        vmem_spec = pl.BlockSpec(memory_space=pltpu.MemorySpace.VMEM)
        return pl.pallas_call(
            mlp_kernel,
            out_shape=out_shape,
            in_specs=[vmem_spec] * 5,
            out_specs=vmem_spec,
            cost_estimate=cost,
        )(x, w1t, b1_2d, w2t, b2_2d)

    # Streaming path: tile only the batch axis with a ragged (cdiv) grid so
    # non-divisible batches keep the pipeline (last partial block is padded on
    # read / masked on write; garbage rows only feed garbage output rows that
    # are never written back).  Weights/biases use a constant index_map so
    # they stay VMEM-resident across the whole grid.  "parallel" lets v7x
    # shard batch steps across its two TensorCores (harmless on v5e/v6e).
    grid = (pl.cdiv(B, tile_b),)
    return pl.pallas_call(
        mlp_kernel,
        out_shape=out_shape,
        grid=grid,
        in_specs=[
            pl.BlockSpec((tile_b, in_dim), lambda i: (i, 0)),
            pl.BlockSpec((in_dim, hid_dim), lambda i: (0, 0)),
            pl.BlockSpec((1, hid_dim), lambda i: (0, 0)),
            pl.BlockSpec((hid_dim, out_dim), lambda i: (0, 0)),
            pl.BlockSpec((1, out_dim), lambda i: (0, 0)),
        ],
        out_specs=pl.BlockSpec((tile_b, out_dim), lambda i: (i, 0)),
        compiler_params=pltpu.CompilerParams(
            dimension_semantics=("parallel",)),
        cost_estimate=cost,
    )(x, w1t, b1_2d, w2t, b2_2d)


def _reference(x, w1, b1, w2, b2):
    # Same math as the PyTorch forward: Linear -> ReLU -> Linear.
    return jnp.maximum(x @ w1.T + b1, 0.0) @ w2.T + b2


def _make_params(key, in_dim, hid_dim, out_dim):
    kw1, kb1, kw2, kb2 = jax.random.split(key, 4)
    bound1 = 1.0 / jnp.sqrt(in_dim)
    bound2 = 1.0 / jnp.sqrt(hid_dim)
    w1 = jax.random.uniform(kw1, (hid_dim, in_dim), jnp.float32, -bound1, bound1)
    b1 = jax.random.uniform(kb1, (hid_dim,), jnp.float32, -bound1, bound1)
    w2 = jax.random.uniform(kw2, (out_dim, hid_dim), jnp.float32, -bound2, bound2)
    b2 = jax.random.uniform(kb2, (out_dim,), jnp.float32, -bound2, bound2)
    return w1, b1, w2, b2


if __name__ == "__main__":
    # Small shapes consistent with the module: flattened images of
    # (num_channels=4, width=4, height=4) -> in_dim = 64.
    in_dim, hid_dim, out_dim = 64, 32, 16

    key = jax.random.PRNGKey(0)
    kx_small, kx_big, kparams = jax.random.split(key, 3)
    w1, b1, w2, b2 = _make_params(kparams, in_dim, hid_dim, out_dim)

    # 1) Small batch: gridless single-block path.
    batch_small = 8
    x_small = jax.random.normal(kx_small, (batch_small, in_dim), jnp.float32)
    out_small = jax.block_until_ready(my_mlp_forward(x_small, w1, b1, w2, b2))
    ref_small = _reference(x_small, w1, b1, w2, b2)
    assert out_small.shape == (batch_small, out_dim)
    assert jnp.allclose(out_small, ref_small, atol=1e-5, rtol=1e-5)

    # 2) Batch-tiled, weights-resident path with a RAGGED grid: 520 rows with
    #    tile_b=256 -> grid (3,), last block partial (padded read/masked write).
    #    (Small tile used only to exercise the ragged path in the test; real
    #    workloads should use the default tile_b=4096.)
    batch_big, tile_b = 520, 256
    x_big = jax.random.normal(kx_big, (batch_big, in_dim), jnp.float32)
    out_big = jax.block_until_ready(
        my_mlp_forward(x_big, w1, b1, w2, b2, tile_b=tile_b))
    ref_big = _reference(x_big, w1, b1, w2, b2)
    assert out_big.shape == (batch_big, out_dim)
    assert jnp.allclose(out_big, ref_big, atol=1e-5, rtol=1e-5)

    print("KERNEL_OK")
</pallas_src>

<mosaic_0001>
module attributes {stable_mosaic.version = 11 : i64} {
  func.func @mlp_kernel(%arg0: memref<8x64xf32, #tpu.memory_space<vmem>>, %arg1: memref<64x32xf32, #tpu.memory_space<vmem>>, %arg2: memref<1x32xf32, #tpu.memory_space<vmem>>, %arg3: memref<32x16xf32, #tpu.memory_space<vmem>>, %arg4: memref<1x16xf32, #tpu.memory_space<vmem>>, %arg5: memref<8x16xf32, #tpu.memory_space<vmem>>) attributes {dimension_semantics = [], scalar_prefetch = 0 : i64, scratch_operands = 0 : i64, tpu.core_type = #tpu.core_type<tc>} {
    %c0 = arith.constant 0 : index
    %c0_0 = arith.constant 0 : index
    %0 = vector.load %arg0[%c0, %c0_0] : memref<8x64xf32, #tpu.memory_space<vmem>>, vector<8x64xf32>
    %c0_1 = arith.constant 0 : index
    %c0_2 = arith.constant 0 : index
    %1 = vector.load %arg1[%c0_1, %c0_2] : memref<64x32xf32, #tpu.memory_space<vmem>>, vector<64x32xf32>
    %cst = arith.constant dense<0.000000e+00> : vector<8x32xf32>
    %2 = tpu.matmul %0, %1, %cst {dimension_numbers = #tpu.dot_dimension_numbers<[1], [0], [0], [1], [0, 0, 1, 1], [], []>} : vector<8x64xf32>, vector<64x32xf32>, vector<8x32xf32> -> vector<8x32xf32>
    %c0_3 = arith.constant 0 : index
    %c0_4 = arith.constant 0 : index
    %3 = vector.load %arg2[%c0_3, %c0_4] : memref<1x32xf32, #tpu.memory_space<vmem>>, vector<1x32xf32>
    %4 = vector.broadcast %3 : vector<1x32xf32> to vector<8x32xf32>
    %5 = arith.addf %2, %4 : vector<8x32xf32>
    %cst_5 = arith.constant 0.000000e+00 : f32
    %6 = vector.broadcast %cst_5 : f32 to vector<8x32xf32>
    %7 = arith.maximumf %5, %6 : vector<8x32xf32>
    %c0_6 = arith.constant 0 : index
    %c0_7 = arith.constant 0 : index
    %8 = vector.load %arg3[%c0_6, %c0_7] : memref<32x16xf32, #tpu.memory_space<vmem>>, vector<32x16xf32>
    %cst_8 = arith.constant dense<0.000000e+00> : vector<8x16xf32>
    %9 = tpu.matmul %7, %8, %cst_8 {dimension_numbers = #tpu.dot_dimension_numbers<[1], [0], [0], [1], [0, 0, 1, 1], [], []>} : vector<8x32xf32>, vector<32x16xf32>, vector<8x16xf32> -> vector<8x16xf32>
    %c0_9 = arith.constant 0 : index
    %c0_10 = arith.constant 0 : index
    %10 = vector.load %arg4[%c0_9, %c0_10] : memref<1x16xf32, #tpu.memory_space<vmem>>, vector<1x16xf32>
    %11 = vector.broadcast %10 : vector<1x16xf32> to vector<8x16xf32>
    %12 = arith.addf %9, %11 : vector<8x16xf32>
    %c0_11 = arith.constant 0 : index
    %c0_12 = arith.constant 0 : index
    %13 = vector.load %arg5[%c0_11, %c0_12] : memref<8x16xf32, #tpu.memory_space<vmem>>, vector<8x16xf32>
    tpu.vector_store %arg5[%c0_11, %c0_12], %12 {strides = array<i32>} : memref<8x16xf32, #tpu.memory_space<vmem>>, vector<8x16xf32>,
    return
  }
}

</mosaic_0001>

<bundles_post_ra>
// kernel: tpu_custom_call.1
= control target key start
LH: loop header
LB: loop body
LE: loop exit
PB: predicated region body
PF: predicated region fallthrough
CT: control target
= control target key end

     0   :  { %s219_s0 = inlined_call_operand.vmem [shape: f32[8,64], index: 0, kind: input, shape index: {}]   ;;  %s220_s1 = inlined_call_operand.vmem [shape: f32[64,32], index: 1, kind: input, shape index: {}]   ;;  %s221_s2 = inlined_call_operand.vmem [shape: f32[1,32], index: 2, kind: input, shape index: {}]   ;;  %s222_s3 = inlined_call_operand.vmem [shape: f32[32,16], index: 3, kind: input, shape index: {}]   ;;  %s223_s4 = inlined_call_operand.vmem [shape: f32[1,16], index: 4, kind: input, shape index: {}]   ;;  %s224_s5 = inlined_call_operand.hbm [shape: f32[8,16], index: 5, kind: output, shape index: {}]  }
   0x1   :  { %v29_v0 = vld [vmem:[%s220_s1 + $0x38] sm:$0xff]  ;;  %v28_v1 = vld [vmem:[%s220_s1 + $0x30] sm:$0xff]  ;;  %v27_v2 = vld [vmem:[%s220_s1 + $0x28] sm:$0xff] }
   0x2   :  { %46 = vmatpush.msra.mxu0 %v29_v0  ;;  %v62_v3 = vld [vmem:[%s222_s3 + $0x18] sm:$0xff]  ;;  %v26_v4 = vld [vmem:[%s220_s1 + $0x20] sm:$0xff] }
   0x3   :  { %83 = vmatpush.msra.mxu1 %v62_v3 }
   0x4   :  { %47 = vmatpush.msra.mxu0 %v28_v1 }
   0x5   :  { %10 = vsyncpa [#allocation3], 0  ;;  %v25_v5 = vld [vmem:[%s220_s1 + $0x18] sm:$0xff]  ;;  %v24_v6 = vld [vmem:[%s220_s1 + $0x10] sm:$0xff]  ;;  %vm34_vm0 = vcmask 523264   ;;  %vm67_vm1 = vcmask 261120  }
   0x6   :  { %48 = vmatpush.msra.mxu0 %v27_v2  ;;  %v23_v7 = vld [vmem:[%s220_s1 + $0x8] sm:$0xff]  ;;  %v22_v8 = vld [vmem:[%s220_s1] sm:$0xff]  ;;  %v61_v10 = vld [vmem:[%s222_s3 + $0x10] sm:$0xff]  ;;  %s140_s21 = smov [#allocation2]   ;;  %vm91_vm2 = vcmask 130048  }
   0x7   :  { %v21_v9 = vld [vmem:[%s219_s0] sm:$0xff]  ;;  %84 = vmatpush.msra.mxu1 %v61_v10  ;;  %v60_v11 = vld [vmem:[%s222_s3 + $0x8] sm:$0xff]  ;;  %s98_s22 = sshll.u32 %s140_s21, 4  ;;  %s99_s22 = int_to_ptr.vmem [resolvable:$true] %s98_s22 }
   0x8   :  { %49 = vmatpush.msra.mxu0 %v26_v4  ;;  %v59_v12 = vld [vmem:[%s222_s3] sm:$0xff]  ;;  %s100_s3 = sshll.u32 %s224_s5, 4  ;;  %s101_s3 = int_to_ptr.hbm [resolvable:$true] %s100_s3 }
   0x9   :  { %85 = vmatpush.msra.mxu1 %v60_v11  ;;  %v112_v13 = vld [vmem:[%s221_s2] ss:$0 sm:$0xff] }
   0xa   :  { %50 = vmatpush.msra.mxu0 %v25_v5  ;;  %v113_v17 = vld [vmem:[%s223_s4] ss:$0 sm:$0xff] }
   0xb   :  { %86 = vmatpush.msra.mxu1 %v59_v12 }
   0xc   :  { %51 = vmatpush.msra.mxu0 %v24_v6 }
   0xe   :  { %52 = vmatpush.msra.mxu0 %v23_v7 }
  0x10   :  { %53 = vmatpush.msra.mxu0 %v22_v8 }
  0x11   :  { %109 = vmatmul.msk.f32.vlgmr.msra.gmra.mxu0 %vm34_vm0, %v21_v9 }
  0x8e   :  { %v55_v14 = vpop.f32.mrf.mxu0 }
  0x8f   :  { %v56_v15 = vadd.f32 %v112_v13, %v55_v14 }
  0x91   :  { %v58_v16 = vmax.f32 %v56_v15, 0.0 }
  0x93   :  { %110 = vmatmul.msk.f32.vlgmr.msra.gmra.mxu1 %vm67_vm1, %v58_v16 }
 0x110   :  { %v88_v18 = vpop.f32.mrf.mxu1 }
 0x111   :  { %v89_v19 = vadd.f32 %v113_v17, %v88_v18 }
 0x113   :  { %92 = vst.msk [vmem:[#allocation2] sm:$0xff] %vm91_vm2, %v89_v19 }
 0x114   :  { %103 = dma.vmem_to_hbm [thread:$0]  %s99_s22, 128, %s101_s3, [#allocation3]  }
 0x115   :  { %138 = dma.done.wait [#allocation3], 128  }
 0x116   :  { %139 = vsyncadd [#allocation3], 4294967168 }
 0x117   :  { %108 = vsyncpa [#allocation3], 1 }

</bundles_post_ra>
